<compile_context>
chip_gen: v5e
topology: v5e:2x2
jax: 0.10.0
libtpu: 0.0.40
codegen_flags: <defaults>
</compile_context>

<pallas_src>
import functools

import jax
import jax.numpy as jnp
from jax import lax
from jax.experimental import pallas as pl
from jax.experimental.pallas import tpu as pltpu


def _round_up(x, m):
    return ((x + m - 1) // m) * m


def _poly_matmul_kernel(x_ref, y_ref, o_ref, *, degree):
    # grid = (N_tiles, M_tiles, K_tiles); K (feature dim) is the reduction
    # axis (last, "arbitrary").  o_ref's block index is invariant in k, so it
    # stays VMEM-resident across the K axis and is used directly as the f32
    # accumulator.
    @pl.when(pl.program_id(2) == 0)
    def _init():
        o_ref[...] = jnp.zeros_like(o_ref)

    # x_ref is a (tk, tn) slab of the (D, N) matrix -> contract dim 0 of both
    # operands (MXU handles the transposed-LHS feed natively).
    o_ref[...] += lax.dot_general(
        x_ref[...],
        y_ref[...],
        dimension_numbers=(((0,), (0,)), ((), ())),
        preferred_element_type=jnp.float32,
    )

    @pl.when(pl.program_id(2) == pl.num_programs(2) - 1)
    def _finalize():
        # degree is a static Python int -> repeated VPU multiplies (no
        # log/exp; safe for negative inner products with odd degrees).
        o_ref[...] = o_ref[...] ** degree


def poly_kernel_pallas(X, Y=None, *, d=3, t=1.0, use_bf16_matmul=False):
    """JAX/Pallas equivalent of PolyKernelTorch.forward.

    X: (D, N), Y: (D, M) (defaults to X).  Returns the (N, M) kernel matrix
    in float32.  `use_bf16_matmul=True` is an opt-in fast path (bf16 MXU
    inputs, f32 accumulation) that changes numerics slightly.
    """
    del t  # unused in the reference forward pass
    degree = int(d)  # must be a static Python int (integer-power lowering)

    if Y is None:
        Y = X
    if X.ndim == 1:
        X = X[:, None]
    if Y.ndim == 1:
        Y = Y[:, None]

    D, N = X.shape
    D2, M = Y.shape
    assert D == D2, "feature dims must match"

    # ---- tile selection --------------------------------------------------
    # K tile: collapse the K axis entirely for small D (single reduction
    # step -> no pipelined init/finalize phases); otherwise 512-wide slabs.
    if D <= 512:
        tk = _round_up(D, 8)
    else:
        tk = 512
    D_pad = _round_up(D, tk)

    # Output tiles: 256x256 fills the 2x256^2 MXU on v6e/v7x and amortizes
    # per-grid-step overhead; for small N/M round up to a lane-dense
    # 128-multiple instead so padding waste stays small.  Budget stays far
    # under v7x's 64 MiB VMEM.
    tn = 256 if N >= 256 else _round_up(N, 128)
    tm = 256 if M >= 256 else _round_up(M, 128)
    N_pad = _round_up(N, tn)
    M_pad = _round_up(M, tm)

    in_dtype = jnp.bfloat16 if use_bf16_matmul else jnp.float32
    x_in = X.astype(in_dtype)
    y_in = Y.astype(in_dtype)
    if (D_pad, N_pad) != (D, N):
        x_in = jnp.pad(x_in, ((0, D_pad - D), (0, N_pad - N)))
    if (D_pad, M_pad) != (D, M):
        y_in = jnp.pad(y_in, ((0, D_pad - D), (0, M_pad - M)))

    grid = (N_pad // tn, M_pad // tm, D_pad // tk)

    # VMEM: double-buffered input slabs + double-buffered resident out tile.
    in_bytes = jnp.dtype(in_dtype).itemsize
    vmem_needed = 2 * (tk * tn + tk * tm) * in_bytes + 2 * tn * tm * 4
    vmem_limit = int(min(max(2 * vmem_needed, 32 << 20), 48 << 20))

    cost = pl.CostEstimate(
        flops=2 * N_pad * M_pad * D_pad + max(degree - 1, 0) * N_pad * M_pad,
        transcendentals=0,
        bytes_accessed=in_bytes * (D_pad * N_pad + D_pad * M_pad)
        + 4 * N_pad * M_pad,
    )

    out = pl.pallas_call(
        functools.partial(_poly_matmul_kernel, degree=degree),
        out_shape=jax.ShapeDtypeStruct((N_pad, M_pad), jnp.float32),
        grid_spec=pltpu.PrefetchScalarGridSpec(
            num_scalar_prefetch=0,
            grid=grid,
            in_specs=[
                pl.BlockSpec((tk, tn), lambda i, j, k: (k, i)),  # X (D, N) slab
                pl.BlockSpec((tk, tm), lambda i, j, k: (k, j)),  # Y (D, M) slab
            ],
            out_specs=pl.BlockSpec((tn, tm), lambda i, j, k: (i, j)),
        ),
        compiler_params=pltpu.CompilerParams(
            dimension_semantics=("parallel", "parallel", "arbitrary"),
            vmem_limit_bytes=vmem_limit,
        ),
        cost_estimate=cost,
    )(x_in, y_in)

    if (N_pad, M_pad) != (N, M):
        out = out[:N, :M]
    return out


if __name__ == "__main__":
    key = jax.random.PRNGKey(0)
    kx, ky = jax.random.split(key)

    # D x N and D x M observation matrices; M is deliberately NOT a multiple
    # of 128 to exercise the padding / lane-dense-store path.
    D_FEAT, N, M = 64, 128, 96
    DEGREE = 3

    X = jax.random.normal(kx, (D_FEAT, N), dtype=jnp.float32)
    Y = jax.random.normal(ky, (D_FEAT, M), dtype=jnp.float32)

    out = poly_kernel_pallas(X, Y, d=DEGREE)
    out = jax.block_until_ready(out)

    ref = jnp.power(
        jnp.matmul(X.T, Y, precision=lax.Precision.HIGHEST), DEGREE
    )
    assert out.shape == (N, M)
    assert jnp.allclose(out, ref, rtol=1e-4, atol=1e-3), "mismatch vs reference"

    # Y-defaults-to-X path
    out_xx = jax.block_until_ready(poly_kernel_pallas(X, d=DEGREE))
    ref_xx = jnp.power(
        jnp.matmul(X.T, X, precision=lax.Precision.HIGHEST), DEGREE
    )
    assert out_xx.shape == (N, N)
    assert jnp.allclose(out_xx, ref_xx, rtol=1e-4, atol=1e-3), "mismatch (X,X)"

    print("KERNEL_OK")
</pallas_src>

<mosaic_0001>
module attributes {stable_mosaic.version = 11 : i64} {
  func.func @_poly_matmul_kernel(%arg0: i32, %arg1: i32, %arg2: i32, %arg3: memref<64x128xf32, #tpu.memory_space<vmem>>, %arg4: memref<64x128xf32, #tpu.memory_space<vmem>>, %arg5: memref<128x128xf32, #tpu.memory_space<vmem>>) attributes {dimension_semantics = [#tpu.dimension_semantics<parallel>, #tpu.dimension_semantics<parallel>, #tpu.dimension_semantics<arbitrary>], iteration_bounds = array<i64: 1, 1, 1>, scalar_prefetch = 0 : i64, scratch_operands = 0 : i64, tpu.core_type = #tpu.core_type<tc>, window_params = [{transform_indices = @transform_0, window_bounds = array<i64: 64, 128>}, {transform_indices = @transform_1, window_bounds = array<i64: 64, 128>}, {transform_indices = @transform_2, window_bounds = array<i64: 128, 128>}]} {
    %c0_i32 = arith.constant 0 : i32
    %0 = arith.cmpi eq, %arg2, %c0_i32 : i32
    %1 = arith.extui %0 : i1 to i32
    %c0_i32_0 = arith.constant 0 : i32
    %2 = arith.cmpi ne, %1, %c0_i32_0 : i32
    scf.if %2 {
      %cst_10 = arith.constant 0.000000e+00 : f32
      %12 = vector.broadcast %cst_10 : f32 to vector<128x128xf32>
      %c0_11 = arith.constant 0 : index
      %c0_12 = arith.constant 0 : index
      %13 = vector.load %arg5[%c0_11, %c0_12] : memref<128x128xf32, #tpu.memory_space<vmem>>, vector<128x128xf32>
      tpu.vector_store %arg5[%c0_11, %c0_12], %12 {strides = array<i32>} : memref<128x128xf32, #tpu.memory_space<vmem>>, vector<128x128xf32>,
    } else {
    }
    %c0 = arith.constant 0 : index
    %c0_1 = arith.constant 0 : index
    %3 = vector.load %arg5[%c0, %c0_1] : memref<128x128xf32, #tpu.memory_space<vmem>>, vector<128x128xf32>
    %c0_2 = arith.constant 0 : index
    %c0_3 = arith.constant 0 : index
    %4 = vector.load %arg3[%c0_2, %c0_3] : memref<64x128xf32, #tpu.memory_space<vmem>>, vector<64x128xf32>
    %c0_4 = arith.constant 0 : index
    %c0_5 = arith.constant 0 : index
    %5 = vector.load %arg4[%c0_4, %c0_5] : memref<64x128xf32, #tpu.memory_space<vmem>>, vector<64x128xf32>
    %cst = arith.constant dense<0.000000e+00> : vector<128x128xf32>
    %6 = tpu.matmul %4, %5, %cst {dimension_numbers = #tpu.dot_dimension_numbers<[0], [0], [1], [1], [0, 1, 1, 1], [], []>} : vector<64x128xf32>, vector<64x128xf32>, vector<128x128xf32> -> vector<128x128xf32>
    %7 = arith.addf %3, %6 : vector<128x128xf32>
    %c0_6 = arith.constant 0 : index
    %c0_7 = arith.constant 0 : index
    %8 = vector.load %arg5[%c0_6, %c0_7] : memref<128x128xf32, #tpu.memory_space<vmem>>, vector<128x128xf32>
    tpu.vector_store %arg5[%c0_6, %c0_7], %7 {strides = array<i32>} : memref<128x128xf32, #tpu.memory_space<vmem>>, vector<128x128xf32>,
    %c0_i32_8 = arith.constant 0 : i32
    %9 = arith.cmpi eq, %arg2, %c0_i32_8 : i32
    %10 = arith.extui %9 : i1 to i32
    %c0_i32_9 = arith.constant 0 : i32
    %11 = arith.cmpi ne, %10, %c0_i32_9 : i32
    scf.if %11 {
      %c0_10 = arith.constant 0 : index
      %c0_11 = arith.constant 0 : index
      %12 = vector.load %arg5[%c0_10, %c0_11] : memref<128x128xf32, #tpu.memory_space<vmem>>, vector<128x128xf32>
      %13 = arith.mulf %12, %12 : vector<128x128xf32>
      %14 = arith.mulf %12, %13 : vector<128x128xf32>
      %c0_12 = arith.constant 0 : index
      %c0_13 = arith.constant 0 : index
      %15 = vector.load %arg5[%c0_12, %c0_13] : memref<128x128xf32, #tpu.memory_space<vmem>>, vector<128x128xf32>
      tpu.vector_store %arg5[%c0_12, %c0_13], %14 {strides = array<i32>} : memref<128x128xf32, #tpu.memory_space<vmem>>, vector<128x128xf32>,
    } else {
    }
    return
  }
  func.func @transform_0(%arg0: i32, %arg1: i32, %arg2: i32) -> (i32, i32) {
    %c0_i32 = arith.constant 0 : i32
    return %arg2, %arg0 : i32, i32
  }
  func.func @transform_1(%arg0: i32, %arg1: i32, %arg2: i32) -> (i32, i32) {
    %c0_i32 = arith.constant 0 : i32
    return %arg2, %arg1 : i32, i32
  }
  func.func @transform_2(%arg0: i32, %arg1: i32, %arg2: i32) -> (i32, i32) {
    %c0_i32 = arith.constant 0 : i32
    return %arg0, %arg1 : i32, i32
  }
}

</mosaic_0001>

<bundles_post_ra>
// kernel: tpu_custom_call.1
= control target key start
LH: loop header
LB: loop body
LE: loop exit
PB: predicated region body
PF: predicated region fallthrough
CT: control target
= control target key end

     0   :  { %7 = vsyncpa [#allocation3], 0  ;;  %s539_s0 = inlined_call_operand.hbm [shape: f32[64,128], index: 0, kind: input, shape index: {}]   ;;  %s540_s1 = inlined_call_operand.hbm [shape: f32[64,128], index: 1, kind: input, shape index: {}]   ;;  %s541_s2 = inlined_call_operand.hbm [shape: f32[128,128], index: 2, kind: output, shape index: {}]  }
   0x1   :  { %8 = vsyncpa [#allocation6], 0 }
   0x2   :  { %9 = vsyncpa [#allocation4], 0  ;;  %s14_s11 = sshll.u32 %s539_s0, 4  ;;  %s485_s12 = smov [#allocation2]   ;;  %s15_s11 = int_to_ptr.hbm [resolvable:$true] %s14_s11 }
   0x3   :  { %s16_s13 = sshll.u32 %s485_s12, 4  ;;  %s27_s16 = sshll.u32 %s540_s1, 4  ;;  %s17_s13 = int_to_ptr.vmem [resolvable:$true] %s16_s13  ;;  %s28_s16 = int_to_ptr.hbm [resolvable:$true] %s27_s16 }
   0x4   :  { %s486_s17 = smov 128   ;;  %s487_s18 = smov 8  }
   0x5   :  { %22 = dma.hbm_to_vmem [thread:$0]  %s15_s11, 1024, %s17_s13, [#allocation3], %s486_s17, %s486_s17, %s487_s18  }
   0x6   :  { %s488_s19 = smov [#allocation5]  }
   0x7   :  { %s29_s20 = sshll.u32 %s488_s19, 4  ;;  %s30_s20 = int_to_ptr.vmem [resolvable:$true] %s29_s20 }
   0x8   :  { %35 = dma.hbm_to_vmem [thread:$0]  %s28_s16, 1024, %s30_s20, [#allocation6], %s486_s17, %s486_s17, %s487_s18  }
   0x9   :  { %479 = dma.done.wait [#allocation3], 1024  }
   0xa   :  { %480 = vsyncadd [#allocation3], 4294966272 }
   0xb   :  { %481 = dma.done.wait [#allocation6], 1024  }
   0xc   :  { %482 = vsyncadd [#allocation6], 4294966272  ;;  %v80_v0 = vld [vmem:[#allocation2] sm:$0xff]  ;;  %v81_v1 = vld [vmem:[#allocation2 + $0x8] sm:$0xff]  ;;  %vm128_vm0 = vcmask 523264   ;;  %s489_s0 = smov [#allocation7]  }
   0xd   :  { %96 = vxpose.xlu0.b32.start [1/8] (short) %v80_v0, 128  ;;  %v82_v2 = vld [vmem:[#allocation2 + $0x10] sm:$0xff]  ;;  %v83_v3 = vld [vmem:[#allocation2 + $0x18] sm:$0xff]  ;;  %v93_v6 = vld [vmem:[#allocation5 + $0x28] sm:$0xff]  ;;  %s345_s1 = sshll.u32 %s489_s0, 4  ;;  %s347_s23 = sshll.u32 %s541_s2, 4  ;;  %s346_s1 = int_to_ptr.vmem [resolvable:$true] %s345_s1  ;;  %s348_s23 = int_to_ptr.hbm [resolvable:$true] %s347_s23 }
   0xe   :  { %v95_v4 = vld [vmem:[#allocation5 + $0x38] sm:$0xff]  ;;  %v94_v5 = vld [vmem:[#allocation5 + $0x30] sm:$0xff]  ;;  %v92_v7 = vld [vmem:[#allocation5 + $0x20] sm:$0xff] }
   0xf   :  { %185 = vmatpush.msra.mxu0 %v95_v4  ;;  %377 = vmatpush.msra.mxu1 %v95_v4  ;;  %v84_v8 = vld [vmem:[#allocation2 + $0x20] sm:$0xff]  ;;  %v91_v9 = vld [vmem:[#allocation5 + $0x18] sm:$0xff]  ;;  %v90_v10 = vld [vmem:[#allocation5 + $0x10] sm:$0xff] }
  0x10   :  { %378 = vmatpush.msra.mxu2 %v95_v4  ;;  %379 = vmatpush.msra.mxu3 %v95_v4  ;;  %v89_v11 = vld [vmem:[#allocation5 + $0x8] sm:$0xff]  ;;  %v88_v12 = vld [vmem:[#allocation5] sm:$0xff]  ;;  %v86_v14 = vld [vmem:[#allocation2 + $0x30] sm:$0xff] }
  0x11   :  { %186 = vmatpush.msra.mxu0 %v94_v5  ;;  %380 = vmatpush.msra.mxu1 %v94_v5  ;;  %v85_v13 = vld [vmem:[#allocation2 + $0x28] sm:$0xff]  ;;  %v87_v15 = vld [vmem:[#allocation2 + $0x38] sm:$0xff] }
  0x12   :  { %381 = vmatpush.msra.mxu2 %v94_v5  ;;  %382 = vmatpush.msra.mxu3 %v94_v5 }
  0x13   :  { %187 = vmatpush.msra.mxu0 %v93_v6  ;;  %383 = vmatpush.msra.mxu1 %v93_v6 }
  0x14   :  { %384 = vmatpush.msra.mxu2 %v93_v6  ;;  %385 = vmatpush.msra.mxu3 %v93_v6 }
  0x15   :  { %97 = vxpose.xlu0.b32.cont [2/8] (short) %v81_v1, 128  ;;  %188 = vmatpush.msra.mxu0 %v92_v7 }
  0x16   :  { %386 = vmatpush.msra.mxu1 %v92_v7  ;;  %387 = vmatpush.msra.mxu2 %v92_v7 }
  0x17   :  { %189 = vmatpush.msra.mxu0 %v91_v9  ;;  %388 = vmatpush.msra.mxu3 %v92_v7 }
  0x18   :  { %389 = vmatpush.msra.mxu1 %v91_v9  ;;  %390 = vmatpush.msra.mxu2 %v91_v9 }
  0x19   :  { %190 = vmatpush.msra.mxu0 %v90_v10  ;;  %391 = vmatpush.msra.mxu3 %v91_v9 }
  0x1a   :  { %392 = vmatpush.msra.mxu1 %v90_v10  ;;  %393 = vmatpush.msra.mxu2 %v90_v10 }
  0x1b   :  { %191 = vmatpush.msra.mxu0 %v89_v11  ;;  %394 = vmatpush.msra.mxu3 %v90_v10 }
  0x1c   :  { %395 = vmatpush.msra.mxu1 %v89_v11  ;;  %396 = vmatpush.msra.mxu2 %v89_v11 }
  0x1d   :  { %98 = vxpose.xlu0.b32.cont [3/8] (short) %v82_v2, 128  ;;  %192 = vmatpush.msra.mxu0 %v88_v12 }
  0x1e   :  { %398 = vmatpush.msra.mxu1 %v88_v12  ;;  %399 = vmatpush.msra.mxu2 %v88_v12 }
  0x1f   :  { %397 = vmatpush.msra.mxu3 %v89_v11 }
  0x21   :  { %400 = vmatpush.msra.mxu3 %v88_v12 }
  0x25   :  { %99 = vxpose.xlu0.b32.cont [4/8] (short) %v83_v3, 128 }
  0x2d   :  { %100 = vxpose.xlu0.b32.cont [5/8] (short) %v84_v8, 128 }
  0x35   :  { %101 = vxpose.xlu0.b32.cont [6/8] (short) %v85_v13, 128 }
  0x3d   :  { %102 = vxpose.xlu0.b32.cont [7/8] (short) %v86_v14, 128 }
  0x45   :  { %103 = vxpose.xlu0.b32.end [8/8] (short) %v87_v15, 128 }
  0xb1   :  { %v112_v16 = vpop.trf.xlu0 }
  0xb2   :  { %361 = vmatmul.msk.f32.vlgmr.msra.gmra.mxu0 %vm128_vm0, %v112_v16 }
  0xb9   :  { %v113_v17 = vpop.trf.xlu0 }
  0xba   :  { %362 = vmatmul.msk.f32.gmra.mxu0 %vm128_vm0, %v113_v17 }
  0xc1   :  { %v114_v18 = vpop.trf.xlu0 }
  0xc2   :  { %363 = vmatmul.msk.f32.gmra.mxu0 %vm128_vm0, %v114_v18 }
  0xc9   :  { %v115_v19 = vpop.trf.xlu0 }
  0xca   :  { %364 = vmatmul.msk.f32.gmra.mxu0 %vm128_vm0, %v115_v19 }
  0xd1   :  { %v116_v20 = vpop.trf.xlu0 }
  0xd2   :  { %365 = vmatmul.msk.f32.vlgmr.msra.gmra.mxu1 %vm128_vm0, %v116_v20 }
  0xd9   :  { %v117_v21 = vpop.trf.xlu0 }
  0xda   :  { %366 = vmatmul.msk.f32.gmra.mxu1 %vm128_vm0, %v117_v21 }
  0xe1   :  { %v118_v22 = vpop.trf.xlu0 }
  0xe2   :  { %367 = vmatmul.msk.f32.gmra.mxu1 %vm128_vm0, %v118_v22 }
  0xe9   :  { %v119_v23 = vpop.trf.xlu0 }
  0xea   :  { %368 = vmatmul.msk.f32.gmra.mxu1 %vm128_vm0, %v119_v23 }
  0xf1   :  { %v120_v24 = vpop.trf.xlu0 }
  0xf2   :  { %369 = vmatmul.msk.f32.vlgmr.msra.gmra.mxu2 %vm128_vm0, %v120_v24 }
  0xf9   :  { %v121_v25 = vpop.trf.xlu0 }
  0xfa   :  { %370 = vmatmul.msk.f32.gmra.mxu2 %vm128_vm0, %v121_v25 }
 0x101   :  { %v122_v26 = vpop.trf.xlu0 }
 0x102   :  { %371 = vmatmul.msk.f32.gmra.mxu2 %vm128_vm0, %v122_v26 }
 0x109   :  { %v123_v27 = vpop.trf.xlu0 }
 0x10a   :  { %372 = vmatmul.msk.f32.gmra.mxu2 %vm128_vm0, %v123_v27 }
 0x111   :  { %v124_v28 = vpop.trf.xlu0 }
 0x112   :  { %373 = vmatmul.msk.f32.vlgmr.msra.gmra.mxu3 %vm128_vm0, %v124_v28 }
 0x119   :  { %v125_v29 = vpop.trf.xlu0 }
 0x11a   :  { %374 = vmatmul.msk.f32.gmra.mxu3 %vm128_vm0, %v125_v29 }
 0x121   :  { %v126_v30 = vpop.trf.xlu0 }
 0x122   :  { %375 = vmatmul.msk.f32.gmra.mxu3 %vm128_vm0, %v126_v30 }
 0x129   :  { %v127_v31 = vpop.trf.xlu0 }
 0x12a   :  { %376 = vmatmul.msk.f32.gmra.mxu3 %vm128_vm0, %v127_v31 }
 0x12f   :  { %v194_v32 = vpop.f32.mrf.mxu0 }
 0x130   :  { %v293_v33 = vmul.f32 %v194_v32, %v194_v32 }
 0x132   :  { %v309_v34 = vmul.f32 %v293_v33, %v194_v32 }
 0x134   :  { %325 = vst [vmem:[#allocation7] sm:$0xff] %v309_v34 }
 0x137   :  { %v197_v35 = vpop.f32.mrf.mxu0 }
 0x138   :  { %v294_v36 = vmul.f32 %v197_v35, %v197_v35 }
 0x13a   :  { %v310_v37 = vmul.f32 %v294_v36, %v197_v35 }
 0x13c   :  { %326 = vst [vmem:[#allocation7 + $0x8] sm:$0xff] %v310_v37 }
 0x13f   :  { %v200_v38 = vpop.f32.mrf.mxu0 }
 0x140   :  { %v295_v39 = vmul.f32 %v200_v38, %v200_v38 }
 0x142   :  { %v311_v40 = vmul.f32 %v295_v39, %v200_v38 }
 0x144   :  { %327 = vst [vmem:[#allocation7 + $0x10] sm:$0xff] %v311_v40 }
 0x147   :  { %v203_v41 = vpop.f32.mrf.mxu0 }
 0x148   :  { %v296_v42 = vmul.f32 %v203_v41, %v203_v41 }
 0x14a   :  { %v312_v43 = vmul.f32 %v296_v42, %v203_v41 }
 0x14c   :  { %328 = vst [vmem:[#allocation7 + $0x18] sm:$0xff] %v312_v43 }
 0x14f   :  { %v206_v44 = vpop.f32.mrf.mxu1 }
 0x150   :  { %v297_v45 = vmul.f32 %v206_v44, %v206_v44 }
 0x152   :  { %v313_v46 = vmul.f32 %v297_v45, %v206_v44 }
 0x154   :  { %329 = vst [vmem:[#allocation7 + $0x20] sm:$0xff] %v313_v46 }
 0x157   :  { %v209_v47 = vpop.f32.mrf.mxu1 }
 0x158   :  { %v298_v48 = vmul.f32 %v209_v47, %v209_v47 }
 0x15a   :  { %v314_v49 = vmul.f32 %v298_v48, %v209_v47 }
 0x15c   :  { %330 = vst [vmem:[#allocation7 + $0x28] sm:$0xff] %v314_v49 }
 0x15f   :  { %v212_v50 = vpop.f32.mrf.mxu1 }
 0x160   :  { %v299_v51 = vmul.f32 %v212_v50, %v212_v50 }
 0x162   :  { %v315_v52 = vmul.f32 %v299_v51, %v212_v50 }
 0x164   :  { %331 = vst [vmem:[#allocation7 + $0x30] sm:$0xff] %v315_v52 }
 0x167   :  { %v215_v53 = vpop.f32.mrf.mxu1 }
 0x168   :  { %v300_v54 = vmul.f32 %v215_v53, %v215_v53 }
 0x16a   :  { %v316_v55 = vmul.f32 %v300_v54, %v215_v53 }
 0x16c   :  { %332 = vst [vmem:[#allocation7 + $0x38] sm:$0xff] %v316_v55 }
 0x175   :  { %v218_v56 = vpop.f32.mrf.mxu2 }
 0x176   :  { %v301_v57 = vmul.f32 %v218_v56, %v218_v56 }
 0x178   :  { %v317_v58 = vmul.f32 %v301_v57, %v218_v56 }
 0x17a   :  { %333 = vst [vmem:[#allocation7 + $0x40] sm:$0xff] %v317_v58 }
 0x17d   :  { %v221_v59 = vpop.f32.mrf.mxu2 }
 0x17e   :  { %v302_v60 = vmul.f32 %v221_v59, %v221_v59 }
 0x180   :  { %v318_v61 = vmul.f32 %v302_v60, %v221_v59 }
 0x182   :  { %334 = vst [vmem:[#allocation7 + $0x48] sm:$0xff] %v318_v61 }
 0x185   :  { %v224_v62 = vpop.f32.mrf.mxu2 }
 0x186   :  { %v303_v63 = vmul.f32 %v224_v62, %v224_v62 }
 0x188   :  { %v319_v0 = vmul.f32 %v303_v63, %v224_v62 }
 0x18a   :  { %335 = vst [vmem:[#allocation7 + $0x50] sm:$0xff] %v319_v0 }
 0x18d   :  { %v227_v1 = vpop.f32.mrf.mxu2 }
 0x18e   :  { %v304_v2 = vmul.f32 %v227_v1, %v227_v1 }
 0x190   :  { %v320_v3 = vmul.f32 %v304_v2, %v227_v1 }
 0x192   :  { %336 = vst [vmem:[#allocation7 + $0x58] sm:$0xff] %v320_v3 }
 0x195   :  { %v230_v4 = vpop.f32.mrf.mxu3 }
 0x196   :  { %v305_v5 = vmul.f32 %v230_v4, %v230_v4 }
 0x198   :  { %v321_v6 = vmul.f32 %v305_v5, %v230_v4 }
 0x19a   :  { %337 = vst [vmem:[#allocation7 + $0x60] sm:$0xff] %v321_v6 }
 0x19d   :  { %v233_v7 = vpop.f32.mrf.mxu3 }
 0x19e   :  { %v306_v8 = vmul.f32 %v233_v7, %v233_v7 }
 0x1a0   :  { %v322_v9 = vmul.f32 %v306_v8, %v233_v7 }
 0x1a2   :  { %338 = vst [vmem:[#allocation7 + $0x68] sm:$0xff] %v322_v9 }
 0x1a5   :  { %v236_v10 = vpop.f32.mrf.mxu3 }
 0x1a6   :  { %v307_v11 = vmul.f32 %v236_v10, %v236_v10 }
 0x1a8   :  { %v323_v12 = vmul.f32 %v307_v11, %v236_v10 }
 0x1aa   :  { %339 = vst [vmem:[#allocation7 + $0x70] sm:$0xff] %v323_v12 }
 0x1ad   :  { %v239_v13 = vpop.f32.mrf.mxu3 }
 0x1ae   :  { %v308_v14 = vmul.f32 %v239_v13, %v239_v13 }
 0x1b0   :  { %v324_v15 = vmul.f32 %v308_v14, %v239_v13 }
 0x1b2   :  { %340 = vst [vmem:[#allocation7 + $0x78] sm:$0xff] %v324_v15 }
 0x1b3   :  { %353 = dma.vmem_to_hbm [thread:$0]  %s346_s1, 2048, %s348_s23, [#allocation4], %s486_s17, %s486_s17, %s487_s18  }
 0x1b4   :  { %483 = dma.done.wait [#allocation4], 2048  }
 0x1b5   :  { %484 = vsyncadd [#allocation4], 4294965248 }
 0x1b6   :  { %358 = vsyncpa [#allocation3], 1 }
 0x1b7   :  { %359 = vsyncpa [#allocation6], 1 }
 0x1b8   :  { %360 = vsyncpa [#allocation4], 1 }

</bundles_post_ra>
